<compile_context>
chip_gen: v6e
topology: v6e:2x2x1
jax: 0.10.0
libtpu: 0.0.40
codegen_flags: <defaults>
</compile_context>

<pallas_src>
import itertools

import numpy as np
import jax
import jax.numpy as jnp
from jax.experimental import pallas as pl
from jax.experimental.pallas import tpu as pltpu

try:  # host-side Hungarian matcher (matches the reference's scipy call)
    from scipy.optimize import linear_sum_assignment as _scipy_lsa
except Exception:  # pragma: no cover
    _scipy_lsa = None


def _round_up(x, m):
    return ((x + m - 1) // m) * m


# ----------------------------------------------------------------------------
# Kernel 1: per-image matcher cost + out_prob  (grid = (N, Q_blocks))
# ----------------------------------------------------------------------------
def detr_cost_kernel(logits_ref, boxes_ref, neg_onehot_ref, tgtT_ref, lam_ref,
                     cost_ref, prob_ref):
    logits = logits_ref[0]                                  # (BQ, C)
    BQ, C = logits.shape

    lane = jax.lax.broadcasted_iota(jnp.int32, (BQ, C), 1)
    cls_mask = lane < (C - 1)

    # out_prob = [softmax(logits[..., :-1]), sigmoid(logits[..., -1:])]
    # computed with an in-register lane mask; single full-tile store.
    m = jnp.max(jnp.where(cls_mask, logits, jnp.float32(-1e30)),
                axis=-1, keepdims=True)
    e = jnp.where(cls_mask, jnp.exp(logits - m), 0.0)
    sm = e / jnp.sum(e, axis=-1, keepdims=True)
    prob = jnp.where(cls_mask, sm, jax.nn.sigmoid(logits))
    prob_ref[0] = prob

    # cost_class = -lambda_cls * out_prob[:, tgt_ids]
    # (-lambda_cls folded into the per-image one-hot gather matrix; obj row 0)
    cost_cls = jnp.dot(prob, neg_onehot_ref[0],
                       preferred_element_type=jnp.float32)   # (BQ, Tp)

    ob = boxes_ref[0]                                       # (BQ, 4) pred cxcywh
    tT = tgtT_ref[0]                                        # (4, Tp)  tgt cxcywh
    ocx, ocy, ow, oh = ob[:, 0:1], ob[:, 1:2], ob[:, 2:3], ob[:, 3:4]
    tcx, tcy, tw, th = tT[0:1, :], tT[1:2, :], tT[2:3, :], tT[3:4, :]

    # cost_bbox = cdist(out_bbox, tgt_bbox, p=1)
    cost_bbox = (jnp.abs(ocx - tcx) + jnp.abs(ocy - tcy)
                 + jnp.abs(ow - tw) + jnp.abs(oh - th))      # (BQ, Tp)

    # generalized IoU in xyxy (exact division for Hungarian parity;
    # enclosing-box extents are always >= 0 for valid boxes -> no clamps)
    ox1, oy1 = ocx - 0.5 * ow, ocy - 0.5 * oh
    ox2, oy2 = ocx + 0.5 * ow, ocy + 0.5 * oh
    tx1, ty1 = tcx - 0.5 * tw, tcy - 0.5 * th
    tx2, ty2 = tcx + 0.5 * tw, tcy + 0.5 * th
    area_o = (ox2 - ox1) * (oy2 - oy1)
    area_t = (tx2 - tx1) * (ty2 - ty1)
    inter = (jnp.maximum(jnp.minimum(ox2, tx2) - jnp.maximum(ox1, tx1), 0.0) *
             jnp.maximum(jnp.minimum(oy2, ty2) - jnp.maximum(oy1, ty1), 0.0))
    union = area_o + area_t - inter
    area_c = ((jnp.maximum(ox2, tx2) - jnp.minimum(ox1, tx1)) *
              (jnp.maximum(oy2, ty2) - jnp.minimum(oy1, ty1)))
    iou = inter / jnp.maximum(union, 1e-12)
    giou = iou - (area_c - union) / jnp.maximum(area_c, 1e-12)

    lam_iou = lam_ref[0]
    lam_l1 = lam_ref[1]
    cost_ref[0] = lam_l1 * cost_bbox + cost_cls - lam_iou * giou


def compute_cost_and_prob(logits, boxes, neg_onehot, tgtT, lam, *, block_q):
    N, Qp, C = logits.shape
    Tp = neg_onehot.shape[2]
    grid = (N, Qp // block_q)
    return pl.pallas_call(
        detr_cost_kernel,
        out_shape=(jax.ShapeDtypeStruct((N, Qp, Tp), jnp.float32),
                   jax.ShapeDtypeStruct((N, Qp, C), jnp.float32)),
        grid=grid,
        in_specs=[
            pl.BlockSpec((1, block_q, C), lambda n, r: (n, r, 0)),
            pl.BlockSpec((1, block_q, 4), lambda n, r: (n, r, 0)),
            pl.BlockSpec((1, C, Tp), lambda n, r: (n, 0, 0)),
            pl.BlockSpec((1, 4, Tp), lambda n, r: (n, 0, 0)),
            pl.BlockSpec(memory_space=pltpu.MemorySpace.SMEM),   # lambdas
        ],
        out_specs=(pl.BlockSpec((1, block_q, Tp), lambda n, r: (n, r, 0)),
                   pl.BlockSpec((1, block_q, C), lambda n, r: (n, r, 0))),
        compiler_params=pltpu.CompilerParams(
            dimension_semantics=("parallel", "parallel")),
    )(logits, boxes, neg_onehot, tgtT, lam)


# ----------------------------------------------------------------------------
# Kernel 2: all per-image loss terms, Nb images per grid step (5 inputs)
# ----------------------------------------------------------------------------
def detr_loss_kernel(prob_ref, box_ref, sel_ref, trow_ref, tT_ref, out_ref):
    prob = prob_ref[...]       # (Nb, Q, C)   out_prob
    boxes = box_ref[...]       # (Nb, Q, 4)   pred boxes (cxcywh)
    sel = sel_ref[...]         # (Nb, Mx, Q)  one-hot matched-query rows
    trow = trow_ref[...]       # (Nb, Mx, C+4) [class one-hot | normalized box]
    tT = tT_ref[...]           # (Nb, 8, Mx)  rows 0-3 cxcywh, row 4 validity

    Nb, Q, C = prob.shape
    Mx = sel.shape[1]

    t_oh = trow[:, :, 0:C]                                 # (Nb, Mx, C)
    t_box = trow[:, :, C:C + 4]                            # (Nb, Mx, 4)
    valid = jnp.sum(sel, axis=2, keepdims=True)            # (Nb, Mx, 1)
    validT = tT[:, 4:5, :]                                 # (Nb, 1, Mx)

    def _sum12(x):  # per-image reduction over (sublane, lane) axes
        return jnp.sum(jnp.sum(x, axis=2, keepdims=True), axis=1, keepdims=True)

    m_cnt = jnp.maximum(_sum12(valid), 1.0)                # (Nb, 1, 1)

    # gather matched rows with batched one-hot matmuls (no host gathers)
    mprob = jnp.einsum('bmq,bqc->bmc', sel, prob,
                       preferred_element_type=jnp.float32)  # (Nb, Mx, C)
    mbbox = jnp.einsum('bmq,bqc->bmc', sel, boxes,
                       preferred_element_type=jnp.float32)  # (Nb, Mx, 4)

    # torch.dist (p=2 over all elements) between matched pred / target boxes
    d = (mbbox - t_box) * valid
    l1 = jnp.sqrt(_sum12(d * d))                            # (Nb, 1, 1)

    # CrossEntropy applied to the already-softmaxed class probs (as reference)
    lane_mc = jax.lax.broadcasted_iota(jnp.int32, (Nb, Mx, C), 2)
    cls_mask = lane_mc < (C - 1)
    mx = jnp.max(jnp.where(cls_mask, mprob, jnp.float32(-1e30)),
                 axis=2, keepdims=True)
    ex = jnp.where(cls_mask, jnp.exp(mprob - mx), 0.0)
    lse = mx + jnp.log(jnp.sum(ex, axis=2, keepdims=True))
    nll = lse - jnp.sum(t_oh * mprob, axis=2, keepdims=True)
    ce = _sum12(nll * valid) / m_cnt

    # objectness lane of matched rows / of all queries
    mobj = jnp.sum(jnp.where(lane_mc == C - 1, mprob, 0.0), axis=2, keepdims=True)
    lane_qc = jax.lax.broadcasted_iota(jnp.int32, (Nb, Q, C), 2)
    obj_q = jnp.sum(jnp.where(lane_qc == C - 1, prob, 0.0), axis=2, keepdims=True)

    # BCE(matched objectness, 1); PyTorch clamps log at -100 (NaN-safe on pads)
    objp = _sum12(-jnp.maximum(jnp.log(jnp.maximum(mobj, 0.0)), -100.0)
                  * valid) / m_cnt
    # BCE(unmatched objectness, 0) = (sum over ALL queries - matched) / (Q - m)
    neg_all = _sum12(-jnp.maximum(jnp.log(jnp.maximum(1.0 - obj_q, 0.0)), -100.0))
    neg_mat = _sum12(-jnp.maximum(jnp.log(jnp.maximum(1.0 - mobj, 0.0)), -100.0)
                     * valid)
    u_cnt = jnp.maximum(float(Q) - _sum12(valid), 1.0)
    objn = (neg_all - neg_mat) / u_cnt

    # sum(1 - box_iou(matched_xyxy, target_xyxy))
    # TODO(synk): box_iou helper not defined by the reference; assumed
    # torchvision-style pairwise (Mx, Mx) IoU matrix.
    ocx, ocy = mbbox[:, :, 0:1], mbbox[:, :, 1:2]
    ow, oh = mbbox[:, :, 2:3], mbbox[:, :, 3:4]
    tcx, tcy = tT[:, 0:1, :], tT[:, 1:2, :]
    tw, th = tT[:, 2:3, :], tT[:, 3:4, :]
    ox1, oy1 = ocx - 0.5 * ow, ocy - 0.5 * oh
    ox2, oy2 = ocx + 0.5 * ow, ocy + 0.5 * oh
    tx1, ty1 = tcx - 0.5 * tw, tcy - 0.5 * th
    tx2, ty2 = tcx + 0.5 * tw, tcy + 0.5 * th
    area_o = (ox2 - ox1) * (oy2 - oy1)
    area_t = (tx2 - tx1) * (ty2 - ty1)
    inter = (jnp.maximum(jnp.minimum(ox2, tx2) - jnp.maximum(ox1, tx1), 0.0) *
             jnp.maximum(jnp.minimum(oy2, ty2) - jnp.maximum(oy1, ty1), 0.0))
    iou = inter / jnp.maximum(area_o + area_t - inter, 1e-12)
    iou_sum = _sum12((1.0 - iou) * (valid * validT))        # (Nb, 1, 1)

    # single lane-dense (8, 128) tile: [l1, ce, obj_pos, obj_neg, iou_sum, 0..]
    lane_o = jax.lax.broadcasted_iota(jnp.int32, (Nb, 8, 128), 2)
    tiles = (jnp.where(lane_o == 0, l1, 0.0)
             + jnp.where(lane_o == 1, ce, 0.0)
             + jnp.where(lane_o == 2, objp, 0.0)
             + jnp.where(lane_o == 3, objn, 0.0)
             + jnp.where(lane_o == 4, iou_sum, 0.0))        # (Nb, 8, 128)
    acc = tiles[0]
    for b in range(1, Nb):                                   # Nb static & small
        acc = acc + tiles[b]
    out_ref[0] = acc


def batched_per_image_losses(prob3, boxes3, sel, trow, tT8, *, nb):
    Np_, Q, C = prob3.shape
    Mx = sel.shape[1]
    n_steps = Np_ // nb
    return pl.pallas_call(
        detr_loss_kernel,
        out_shape=jax.ShapeDtypeStruct((n_steps, 8, 128), jnp.float32),
        grid=(n_steps,),
        in_specs=[
            pl.BlockSpec((nb, Q, C), lambda i: (i, 0, 0)),
            pl.BlockSpec((nb, Q, 4), lambda i: (i, 0, 0)),
            pl.BlockSpec((nb, Mx, Q), lambda i: (i, 0, 0)),
            pl.BlockSpec((nb, Mx, C + 4), lambda i: (i, 0, 0)),
            pl.BlockSpec((nb, 8, Mx), lambda i: (i, 0, 0)),
        ],
        out_specs=pl.BlockSpec((1, 8, 128), lambda i: (i, 0, 0)),
        compiler_params=pltpu.CompilerParams(
            dimension_semantics=("parallel",)),
    )(prob3, boxes3, sel, trow, tT8)


# ----------------------------------------------------------------------------
# Host-side Hungarian matching
# ----------------------------------------------------------------------------
def linear_sum_assignment_host(cost):
    # TODO(synk): combinatorial assignment has no Pallas equivalent; host solve.
    cost = np.asarray(cost, np.float64)
    if _scipy_lsa is not None:
        r, c = _scipy_lsa(cost)
        return np.asarray(r), np.asarray(c)
    nr, nc = cost.shape
    assert nr >= nc, "fallback matcher expects num_queries >= num_targets"
    best_rows, best_val = (), np.inf
    for rows in itertools.permutations(range(nr), nc):
        v = sum(cost[r, c] for c, r in enumerate(rows))
        if v < best_val:
            best_val, best_rows = v, rows
    row_ind = np.asarray(best_rows, np.int64)
    col_ind = np.arange(nc, dtype=np.int64)
    order = np.argsort(row_ind)
    return row_ind[order], col_ind[order]


# ----------------------------------------------------------------------------
# DETRLoss glue driving the two Pallas kernels
# ----------------------------------------------------------------------------
class DETRLossPallas:
    def __init__(self, lambda_cls, lambda_iou, lambda_L1):
        self.lambda_cls = float(lambda_cls)
        self.lambda_iou = float(lambda_iou)
        self.lambda_L1 = float(lambda_L1)

    @staticmethod
    def _normalize(boxes, w, h):
        return boxes / np.array([w, h, w, h], dtype=np.float32)

    def __call__(self, outputs, targets, size):
        logits = jnp.asarray(outputs['pred_logits'], jnp.float32)   # (N, Q, C)
        boxes = jnp.asarray(outputs['pred_boxes'], jnp.float32)     # (N, Q, 4)
        N, Q, C = logits.shape
        h, w = float(size[0]), float(size[1])

        sizes = [int(len(t['boxes'])) for t in targets]
        Tmax = max(max(sizes), 1)
        Tp = _round_up(Tmax, 128)                     # lane-dense cost columns

        # ---- per-image matcher-cost inputs (block-diagonal work only) ----
        neg_onehot = np.zeros((N, C, Tp), np.float32)   # -lambda_cls folded in
        tgtT = np.full((N, 4, Tp), 0.5, np.float32)     # valid dummy pad boxes
        tgt_boxes_norm = []
        for i, t in enumerate(targets):
            Ti = sizes[i]
            bx = self._normalize(np.asarray(t['boxes'], np.float32), w, h)
            tgt_boxes_norm.append(bx)
            if Ti:
                lab = np.asarray(t['labels']).astype(np.int64)
                neg_onehot[i, lab, np.arange(Ti)] = -self.lambda_cls
                tgtT[i, :, :Ti] = bx.T

        # row blocking over queries; with N >= 2 the parallel grid has >= 2
        # steps (both v7x TensorCores used); tile-size knee is ~256-512 rows.
        if Q <= 256:
            BQ, Qp = Q, Q
            logits_p, boxes_p = logits, boxes
        else:
            BQ = 256
            Qp = _round_up(Q, BQ)
            logits_p = jnp.pad(logits, ((0, 0), (0, Qp - Q), (0, 0)))
            boxes_p = jnp.pad(boxes, ((0, 0), (0, Qp - Q), (0, 0)),
                              constant_values=0.5)

        lam = jnp.asarray([self.lambda_iou, self.lambda_L1], dtype=jnp.float32)
        cost, prob = compute_cost_and_prob(
            logits_p, boxes_p, jnp.asarray(neg_onehot), jnp.asarray(tgtT),
            lam, block_q=BQ)

        # ---- Hungarian assignment on host (slice on device first) ----
        cost_np = np.asarray(jax.device_get(cost[:, :Q, :Tmax]))
        indices = [linear_sum_assignment_host(cost_np[i, :, :sizes[i]])
                   for i in range(N)]

        # ---- kernel-2 packing: 5 inputs, Nb images per grid step ----
        Mx = _round_up(Tmax, 8)
        Nb = min(N, 8)
        Npad = _round_up(N, Nb)
        sel = np.zeros((Npad, Mx, Q), np.float32)
        trow = np.zeros((Npad, Mx, C + 4), np.float32)
        tT8 = np.zeros((Npad, 8, Mx), np.float32)
        for i, (q_idx, t_idx) in enumerate(indices):
            q_idx = np.asarray(q_idx, np.int64)
            t_idx = np.asarray(t_idx, np.int64)
            M = q_idx.shape[0]
            if M == 0:
                continue
            labels_i = np.asarray(targets[i]['labels'])[t_idx]
            boxes_i = tgt_boxes_norm[i][t_idx, :]
            sel[i, np.arange(M), q_idx] = 1.0
            trow[i, np.arange(M), labels_i] = 1.0
            trow[i, :M, C:C + 4] = boxes_i
            tT8[i, 0:4, :M] = boxes_i.T
            tT8[i, 4, :M] = 1.0

        prob3 = prob[:, :Q, :]
        boxes3 = boxes
        if Npad != N:  # zero-padded images contribute exactly zero loss
            prob3 = jnp.concatenate(
                [prob3, jnp.zeros((Npad - N, Q, C), jnp.float32)], axis=0)
            boxes3 = jnp.concatenate(
                [boxes3, jnp.zeros((Npad - N, Q, 4), jnp.float32)], axis=0)

        res = batched_per_image_losses(
            prob3, boxes3, jnp.asarray(sel), jnp.asarray(trow),
            jnp.asarray(tT8), nb=Nb)                       # (n_steps, 8, 128)

        terms = jnp.sum(res[:, 0, :], axis=0)  # lanes: [l1, ce, obj+, obj-, iou]
        L1_loss, cls_loss = terms[0], terms[1]
        obj_loss = terms[2] + terms[3]
        iou_loss = terms[4]
        loss = (cls_loss * self.lambda_cls + obj_loss * self.lambda_cls
                + iou_loss * self.lambda_iou + L1_loss * self.lambda_L1)
        return loss


# ----------------------------------------------------------------------------
if __name__ == "__main__":
    N, Q, C = 2, 8, 8          # C = 7 classes + 1 objectness logit
    H, W = 64.0, 64.0

    key = jax.random.PRNGKey(0)
    k1, k2 = jax.random.split(key)
    pred_logits = jax.random.normal(k1, (N, Q, C), dtype=jnp.float32)
    pred_boxes = jax.nn.sigmoid(jax.random.normal(k2, (N, Q, 4), dtype=jnp.float32))

    rng = np.random.default_rng(0)
    targets = []
    for s in (3, 2):
        labels = rng.integers(0, C - 1, size=(s,)).astype(np.int64)
        cxcy = rng.uniform(14.0, 50.0, size=(s, 2))
        wh = rng.uniform(6.0, 22.0, size=(s, 2))
        targets.append({'labels': labels,
                        'boxes': np.concatenate([cxcy, wh], axis=1).astype(np.float32)})

    loss_fn = DETRLossPallas(lambda_cls=1.0, lambda_iou=2.0, lambda_L1=5.0)
    loss = loss_fn({'pred_logits': pred_logits, 'pred_boxes': pred_boxes},
                   targets, (H, W))
    jax.block_until_ready(loss)
    assert np.isfinite(float(loss))
    print("KERNEL_OK")
</pallas_src>

<mosaic_0001>
module attributes {stable_mosaic.version = 11 : i64} {
  func.func @detr_cost_kernel(%arg0: i32, %arg1: i32, %arg2: memref<1x8x8xf32, #tpu.memory_space<vmem>>, %arg3: memref<1x8x4xf32, #tpu.memory_space<vmem>>, %arg4: memref<1x8x128xf32, #tpu.memory_space<vmem>>, %arg5: memref<1x4x128xf32, #tpu.memory_space<vmem>>, %arg6: memref<2xf32, #tpu.memory_space<smem>>, %arg7: memref<1x8x128xf32, #tpu.memory_space<vmem>>, %arg8: memref<1x8x8xf32, #tpu.memory_space<vmem>>) attributes {dimension_semantics = [#tpu.dimension_semantics<parallel>, #tpu.dimension_semantics<parallel>], iteration_bounds = array<i64: 2, 1>, scalar_prefetch = 0 : i64, scratch_operands = 0 : i64, tpu.core_type = #tpu.core_type<tc>, window_params = [{transform_indices = @transform_0, window_bounds = array<i64: 1, 8, 8>}, {transform_indices = @transform_1, window_bounds = array<i64: 1, 8, 4>}, {transform_indices = @transform_2, window_bounds = array<i64: 1, 8, 128>}, {transform_indices = @transform_3, window_bounds = array<i64: 1, 4, 128>}, {transform_indices = @transform_4, window_bounds = array<i64: 2>}, {transform_indices = @transform_5, window_bounds = array<i64: 1, 8, 128>}, {transform_indices = @transform_6, window_bounds = array<i64: 1, 8, 8>}]} {
    %c0 = arith.constant 0 : index
    %c0_0 = arith.constant 0 : index
    %c0_1 = arith.constant 0 : index
    %0 = vector.load %arg2[%c0, %c0_0, %c0_1] : memref<1x8x8xf32, #tpu.memory_space<vmem>>, vector<1x8x8xf32>
    %1 = vector.shape_cast %0 : vector<1x8x8xf32> to vector<8x8xf32>
    %2 = tpu.iota {dimensions = array<i32: 1>} : vector<8x8xi32>
    %c7_i32 = arith.constant 7 : i32
    %3 = vector.broadcast %c7_i32 : i32 to vector<8x8xi32>
    %4 = arith.cmpi slt, %2, %3 : vector<8x8xi32>
    %cst = arith.constant -1.000000e+30 : f32
    %5 = vector.broadcast %cst : f32 to vector<8x8xf32>
    %6 = arith.select %4, %1, %5 : vector<8x8xi1>, vector<8x8xf32>
    %cst_2 = arith.constant dense<0xFF800000> : vector<8xf32>
    %7 = vector.multi_reduction <maximumf>, %6, %cst_2 [1] : vector<8x8xf32> to vector<8xf32>
    %8 = vector.shape_cast %7 : vector<8xf32> to vector<8x1xf32>
    %9 = vector.broadcast %8 : vector<8x1xf32> to vector<8x8xf32>
    %10 = arith.subf %1, %9 : vector<8x8xf32>
    %11 = math.exp %10 : vector<8x8xf32>
    %cst_3 = arith.constant 0.000000e+00 : f32
    %12 = vector.broadcast %cst_3 : f32 to vector<8x8xf32>
    %13 = arith.select %4, %11, %12 : vector<8x8xi1>, vector<8x8xf32>
    %cst_4 = arith.constant dense<0.000000e+00> : vector<8xf32>
    %14 = vector.multi_reduction <add>, %13, %cst_4 [1] : vector<8x8xf32> to vector<8xf32>
    %15 = vector.shape_cast %14 : vector<8xf32> to vector<8x1xf32>
    %16 = vector.broadcast %15 : vector<8x1xf32> to vector<8x8xf32>
    %17 = arith.divf %13, %16 : vector<8x8xf32>
    %18 = arith.negf %1 : vector<8x8xf32>
    %19 = math.exp %18 : vector<8x8xf32>
    %cst_5 = arith.constant 1.000000e+00 : f32
    %20 = vector.broadcast %cst_5 : f32 to vector<8x8xf32>
    %21 = arith.addf %20, %19 : vector<8x8xf32>
    %22 = arith.divf %20, %21 : vector<8x8xf32>
    %23 = arith.select %4, %17, %22 : vector<8x8xi1>, vector<8x8xf32>
    %c0_6 = arith.constant 0 : index
    %c0_7 = arith.constant 0 : index
    %c0_8 = arith.constant 0 : index
    %24 = vector.load %arg8[%c0_6, %c0_7, %c0_8] : memref<1x8x8xf32, #tpu.memory_space<vmem>>, vector<1x8x8xf32>
    %25 = vector.shape_cast %24 : vector<1x8x8xf32> to vector<8x8xf32>
    %26 = vector.shape_cast %23 : vector<8x8xf32> to vector<1x8x8xf32>
    tpu.vector_store %arg8[%c0_6, %c0_7, %c0_8], %26 {strides = array<i32>} : memref<1x8x8xf32, #tpu.memory_space<vmem>>, vector<1x8x8xf32>,
    %c0_9 = arith.constant 0 : index
    %c0_10 = arith.constant 0 : index
    %c0_11 = arith.constant 0 : index
    %27 = vector.load %arg4[%c0_9, %c0_10, %c0_11] : memref<1x8x128xf32, #tpu.memory_space<vmem>>, vector<1x8x128xf32>
    %28 = vector.shape_cast %27 : vector<1x8x128xf32> to vector<8x128xf32>
    %cst_12 = arith.constant dense<0.000000e+00> : vector<8x128xf32>
    %29 = tpu.matmul %23, %28, %cst_12 {dimension_numbers = #tpu.dot_dimension_numbers<[1], [0], [0], [1], [0, 0, 1, 1], [], []>} : vector<8x8xf32>, vector<8x128xf32>, vector<8x128xf32> -> vector<8x128xf32>
    %c0_13 = arith.constant 0 : index
    %c0_14 = arith.constant 0 : index
    %c0_15 = arith.constant 0 : index
    %30 = vector.load %arg3[%c0_13, %c0_14, %c0_15] : memref<1x8x4xf32, #tpu.memory_space<vmem>>, vector<1x8x4xf32>
    %31 = vector.shape_cast %30 : vector<1x8x4xf32> to vector<8x4xf32>
    %c0_16 = arith.constant 0 : index
    %c0_17 = arith.constant 0 : index
    %c0_18 = arith.constant 0 : index
    %32 = vector.load %arg5[%c0_16, %c0_17, %c0_18] : memref<1x4x128xf32, #tpu.memory_space<vmem>>, vector<1x4x128xf32>
    %33 = vector.shape_cast %32 : vector<1x4x128xf32> to vector<4x128xf32>
    %34 = vector.extract_strided_slice %31 {offsets = [0, 0], sizes = [8, 1], strides = [1, 1]} : vector<8x4xf32> to vector<8x1xf32>
    %35 = vector.extract_strided_slice %31 {offsets = [0, 1], sizes = [8, 1], strides = [1, 1]} : vector<8x4xf32> to vector<8x1xf32>
    %36 = vector.extract_strided_slice %31 {offsets = [0, 2], sizes = [8, 1], strides = [1, 1]} : vector<8x4xf32> to vector<8x1xf32>
    %37 = vector.extract_strided_slice %31 {offsets = [0, 3], sizes = [8, 1], strides = [1, 1]} : vector<8x4xf32> to vector<8x1xf32>
    %38 = vector.extract_strided_slice %33 {offsets = [0, 0], sizes = [1, 128], strides = [1, 1]} : vector<4x128xf32> to vector<1x128xf32>
    %39 = vector.extract_strided_slice %33 {offsets = [1, 0], sizes = [1, 128], strides = [1, 1]} : vector<4x128xf32> to vector<1x128xf32>
    %40 = vector.extract_strided_slice %33 {offsets = [2, 0], sizes = [1, 128], strides = [1, 1]} : vector<4x128xf32> to vector<1x128xf32>
    %41 = vector.extract_strided_slice %33 {offsets = [3, 0], sizes = [1, 128], strides = [1, 1]} : vector<4x128xf32> to vector<1x128xf32>
    %42 = vector.broadcast %34 : vector<8x1xf32> to vector<8x128xf32>
    %43 = vector.broadcast %38 : vector<1x128xf32> to vector<8x128xf32>
    %44 = arith.subf %42, %43 : vector<8x128xf32>
    %45 = math.absf %44 : vector<8x128xf32>
    %46 = vector.broadcast %35 : vector<8x1xf32> to vector<8x128xf32>
    %47 = vector.broadcast %39 : vector<1x128xf32> to vector<8x128xf32>
    %48 = arith.subf %46, %47 : vector<8x128xf32>
    %49 = math.absf %48 : vector<8x128xf32>
    %50 = arith.addf %45, %49 : vector<8x128xf32>
    %51 = vector.broadcast %36 : vector<8x1xf32> to vector<8x128xf32>
    %52 = vector.broadcast %40 : vector<1x128xf32> to vector<8x128xf32>
    %53 = arith.subf %51, %52 : vector<8x128xf32>
    %54 = math.absf %53 : vector<8x128xf32>
    %55 = arith.addf %50, %54 : vector<8x128xf32>
    %56 = vector.broadcast %37 : vector<8x1xf32> to vector<8x128xf32>
    %57 = vector.broadcast %41 : vector<1x128xf32> to vector<8x128xf32>
    %58 = arith.subf %56, %57 : vector<8x128xf32>
    %59 = math.absf %58 : vector<8x128xf32>
    %60 = arith.addf %55, %59 : vector<8x128xf32>
    %cst_19 = arith.constant 5.000000e-01 : f32
    %61 = vector.broadcast %cst_19 : f32 to vector<8x1xf32>
    %62 = arith.mulf %61, %36 : vector<8x1xf32>
    %63 = arith.subf %34, %62 : vector<8x1xf32>
    %cst_20 = arith.constant 5.000000e-01 : f32
    %64 = vector.broadcast %cst_20 : f32 to vector<8x1xf32>
    %65 = arith.mulf %64, %37 : vector<8x1xf32>
    %66 = arith.subf %35, %65 : vector<8x1xf32>
    %cst_21 = arith.constant 5.000000e-01 : f32
    %67 = vector.broadcast %cst_21 : f32 to vector<8x1xf32>
    %68 = arith.mulf %67, %36 : vector<8x1xf32>
    %69 = arith.addf %34, %68 : vector<8x1xf32>
    %cst_22 = arith.constant 5.000000e-01 : f32
    %70 = vector.broadcast %cst_22 : f32 to vector<8x1xf32>
    %71 = arith.mulf %70, %37 : vector<8x1xf32>
    %72 = arith.addf %35, %71 : vector<8x1xf32>
    %cst_23 = arith.constant 5.000000e-01 : f32
    %73 = vector.broadcast %cst_23 : f32 to vector<1x128xf32>
    %74 = arith.mulf %73, %40 : vector<1x128xf32>
    %75 = arith.subf %38, %74 : vector<1x128xf32>
    %cst_24 = arith.constant 5.000000e-01 : f32
    %76 = vector.broadcast %cst_24 : f32 to vector<1x128xf32>
    %77 = arith.mulf %76, %41 : vector<1x128xf32>
    %78 = arith.subf %39, %77 : vector<1x128xf32>
    %cst_25 = arith.constant 5.000000e-01 : f32
    %79 = vector.broadcast %cst_25 : f32 to vector<1x128xf32>
    %80 = arith.mulf %79, %40 : vector<1x128xf32>
    %81 = arith.addf %38, %80 : vector<1x128xf32>
    %cst_26 = arith.constant 5.000000e-01 : f32
    %82 = vector.broadcast %cst_26 : f32 to vector<1x128xf32>
    %83 = arith.mulf %82, %41 : vector<1x128xf32>
    %84 = arith.addf %39, %83 : vector<1x128xf32>
    %85 = arith.subf %69, %63 : vector<8x1xf32>
    %86 = arith.subf %72, %66 : vector<8x1xf32>
    %87 = arith.mulf %85, %86 : vector<8x1xf32>
    %88 = arith.subf %81, %75 : vector<1x128xf32>
    %89 = arith.subf %84, %78 : vector<1x128xf32>
    %90 = arith.mulf %88, %89 : vector<1x128xf32>
    %91 = vector.broadcast %69 : vector<8x1xf32> to vector<8x128xf32>
    %92 = vector.broadcast %81 : vector<1x128xf32> to vector<8x128xf32>
    %93 = arith.minimumf %91, %92 : vector<8x128xf32>
    %94 = vector.broadcast %63 : vector<8x1xf32> to vector<8x128xf32>
    %95 = vector.broadcast %75 : vector<1x128xf32> to vector<8x128xf32>
    %96 = arith.maximumf %94, %95 : vector<8x128xf32>
    %97 = arith.subf %93, %96 : vector<8x128xf32>
    %cst_27 = arith.constant 0.000000e+00 : f32
    %98 = vector.broadcast %cst_27 : f32 to vector<8x128xf32>
    %99 = arith.maximumf %97, %98 : vector<8x128xf32>
    %100 = vector.broadcast %72 : vector<8x1xf32> to vector<8x128xf32>
    %101 = vector.broadcast %84 : vector<1x128xf32> to vector<8x128xf32>
    %102 = arith.minimumf %100, %101 : vector<8x128xf32>
    %103 = vector.broadcast %66 : vector<8x1xf32> to vector<8x128xf32>
    %104 = vector.broadcast %78 : vector<1x128xf32> to vector<8x128xf32>
    %105 = arith.maximumf %103, %104 : vector<8x128xf32>
    %106 = arith.subf %102, %105 : vector<8x128xf32>
    %cst_28 = arith.constant 0.000000e+00 : f32
    %107 = vector.broadcast %cst_28 : f32 to vector<8x128xf32>
    %108 = arith.maximumf %106, %107 : vector<8x128xf32>
    %109 = arith.mulf %99, %108 : vector<8x128xf32>
    %110 = vector.broadcast %87 : vector<8x1xf32> to vector<8x128xf32>
    %111 = vector.broadcast %90 : vector<1x128xf32> to vector<8x128xf32>
    %112 = arith.addf %110, %111 : vector<8x128xf32>
    %113 = arith.subf %112, %109 : vector<8x128xf32>
    %114 = vector.broadcast %69 : vector<8x1xf32> to vector<8x128xf32>
    %115 = vector.broadcast %81 : vector<1x128xf32> to vector<8x128xf32>
    %116 = arith.maximumf %114, %115 : vector<8x128xf32>
    %117 = vector.broadcast %63 : vector<8x1xf32> to vector<8x128xf32>
    %118 = vector.broadcast %75 : vector<1x128xf32> to vector<8x128xf32>
    %119 = arith.minimumf %117, %118 : vector<8x128xf32>
    %120 = arith.subf %116, %119 : vector<8x128xf32>
    %121 = vector.broadcast %72 : vector<8x1xf32> to vector<8x128xf32>
    %122 = vector.broadcast %84 : vector<1x128xf32> to vector<8x128xf32>
    %123 = arith.maximumf %121, %122 : vector<8x128xf32>
    %124 = vector.broadcast %66 : vector<8x1xf32> to vector<8x128xf32>
    %125 = vector.broadcast %78 : vector<1x128xf32> to vector<8x128xf32>
    %126 = arith.minimumf %124, %125 : vector<8x128xf32>
    %127 = arith.subf %123, %126 : vector<8x128xf32>
    %128 = arith.mulf %120, %127 : vector<8x128xf32>
    %cst_29 = arith.constant 9.99999996E-13 : f32
    %129 = vector.broadcast %cst_29 : f32 to vector<8x128xf32>
    %130 = arith.maximumf %113, %129 : vector<8x128xf32>
    %131 = arith.divf %109, %130 : vector<8x128xf32>
    %132 = arith.subf %128, %113 : vector<8x128xf32>
    %cst_30 = arith.constant 9.99999996E-13 : f32
    %133 = vector.broadcast %cst_30 : f32 to vector<8x128xf32>
    %134 = arith.maximumf %128, %133 : vector<8x128xf32>
    %135 = arith.divf %132, %134 : vector<8x128xf32>
    %136 = arith.subf %131, %135 : vector<8x128xf32>
    %c0_31 = arith.constant 0 : index
    %137 = memref.load %arg6[%c0_31] : memref<2xf32, #tpu.memory_space<smem>>
    %c1 = arith.constant 1 : index
    %138 = memref.load %arg6[%c1] : memref<2xf32, #tpu.memory_space<smem>>
    %139 = vector.broadcast %138 : f32 to vector<8x128xf32>
    %140 = arith.mulf %139, %60 : vector<8x128xf32>
    %141 = arith.addf %140, %29 : vector<8x128xf32>
    %142 = vector.broadcast %137 : f32 to vector<8x128xf32>
    %143 = arith.mulf %142, %136 : vector<8x128xf32>
    %144 = arith.subf %141, %143 : vector<8x128xf32>
    %c0_32 = arith.constant 0 : index
    %c0_33 = arith.constant 0 : index
    %c0_34 = arith.constant 0 : index
    %145 = vector.load %arg7[%c0_32, %c0_33, %c0_34] : memref<1x8x128xf32, #tpu.memory_space<vmem>>, vector<1x8x128xf32>
    %146 = vector.shape_cast %145 : vector<1x8x128xf32> to vector<8x128xf32>
    %147 = vector.shape_cast %144 : vector<8x128xf32> to vector<1x8x128xf32>
    tpu.vector_store %arg7[%c0_32, %c0_33, %c0_34], %147 {strides = array<i32>} : memref<1x8x128xf32, #tpu.memory_space<vmem>>, vector<1x8x128xf32>,
    return
  }
  func.func @transform_0(%arg0: i32, %arg1: i32) -> (i32, i32, i32) {
    %c0_i32 = arith.constant 0 : i32
    %c0_i32_0 = arith.constant 0 : i32
    return %arg0, %arg1, %c0_i32 : i32, i32, i32
  }
  func.func @transform_1(%arg0: i32, %arg1: i32) -> (i32, i32, i32) {
    %c0_i32 = arith.constant 0 : i32
    %c0_i32_0 = arith.constant 0 : i32
    return %arg0, %arg1, %c0_i32 : i32, i32, i32
  }
  func.func @transform_2(%arg0: i32, %arg1: i32) -> (i32, i32, i32) {
    %c0_i32 = arith.constant 0 : i32
    %c0_i32_0 = arith.constant 0 : i32
    %c0_i32_1 = arith.constant 0 : i32
    return %arg0, %c0_i32, %c0_i32_0 : i32, i32, i32
  }
  func.func @transform_3(%arg0: i32, %arg1: i32) -> (i32, i32, i32) {
    %c0_i32 = arith.constant 0 : i32
    %c0_i32_0 = arith.constant 0 : i32
    %c0_i32_1 = arith.constant 0 : i32
    return %arg0, %c0_i32, %c0_i32_0 : i32, i32, i32
  }
  func.func @transform_4(%arg0: i32, %arg1: i32) -> i32 {
    %c0_i32 = arith.constant 0 : i32
    %c0_i32_0 = arith.constant 0 : i32
    return %c0_i32 : i32
  }
  func.func @transform_5(%arg0: i32, %arg1: i32) -> (i32, i32, i32) {
    %c0_i32 = arith.constant 0 : i32
    %c0_i32_0 = arith.constant 0 : i32
    return %arg0, %arg1, %c0_i32 : i32, i32, i32
  }
  func.func @transform_6(%arg0: i32, %arg1: i32) -> (i32, i32, i32) {
    %c0_i32 = arith.constant 0 : i32
    %c0_i32_0 = arith.constant 0 : i32
    return %arg0, %arg1, %c0_i32 : i32, i32, i32
  }
}

</mosaic_0001>

<bundles_post_ra>
// kernel: tpu_custom_call.1
= control target key start
LH: loop header
LB: loop body
LE: loop exit
PB: predicated region body
PF: predicated region fallthrough
CT: control target
= control target key end

     0   :  { %s1429_s0 = inlined_call_operand.vmem [shape: f32[2,8,8], index: 0, kind: input, shape index: {}]   ;;  %s1430_s1 = inlined_call_operand.vmem [shape: f32[2,8,4], index: 1, kind: input, shape index: {}]   ;;  %s1431_s2 = inlined_call_operand.hbm [shape: f32[2,8,128], index: 2, kind: input, shape index: {}]   ;;  %s1432_s3 = inlined_call_operand.vmem [shape: f32[2,4,128], index: 3, kind: input, shape index: {}]   ;;  %s1433_s4 = inlined_call_operand.vmem [shape: f32[2], index: 4, kind: input, shape index: {}]   ;;  %s1434_s5 = inlined_call_operand.hbm [shape: f32[2,8,128], index: 5, kind: output, shape index: {0}]   ;;  %s1435_s6 = inlined_call_operand.hbm [shape: f32[2,8,8], index: 6, kind: output, shape index: {1}]  }
   0x1   :  { %1438 = sst [smem:[#allocation15_spill]] %s1433_s4 }
   0x2   :  { %12 = vsyncpa [#allocation3], 0 }
   0x3   :  { %14 = vsyncpa [#allocation3 + $0x1], 0 }
   0x4   :  { %15 = vsyncpa [#allocation5], 0 }
   0x5   :  { %16 = vsyncpa [#allocation4], 0 }
   0x6   :  { %18 = vsyncpa [#allocation4 + $0x1], 0 }
   0x7   :  { %19 = vsyncpa [#allocation9], 0 }
   0x8   :  { %21 = vsyncpa [#allocation9 + $0x1], 0  ;;  %s1171_s21 = smov 0   ;;  %s1173_s22 = smov 0  }
   0x9   :  { %s1175_s23 = smov 0   ;;  %s1177_s24 = smov 0  }
   0xa   :  { %s1179_s25 = smov 0   ;;  %s1181_s26 = smov 0  }
   0xb LB: > { %s829_s27 = sadd.s32 4294967295, %s1122_s26   ;;  %s830_s28 = sadd.s32 4294967294, %s1122_s26   ;;  %s1122_s26 = sphi %s1181_s26, %s27_s26   ;;  %s1118_s25 = sphi %s1179_s25, %s1457_s25   ;;  %s1114_s24 = sphi %s1177_s24, %s1456_s24   ;;  %s1110_s23 = sphi %s1175_s23, %s1455_s23   ;;  %s1106_s22 = sphi %s1173_s22, %s1454_s22   ;;  %s1102_s21 = sphi %s1171_s21, %s1453_s21  }
   0xc   : > { %p115_p0 = scmp.ne.s32.totalorder %s1106_s22, %s1102_s21  ;;  %p1205_p1 = scmp.eq.s32.totalorder %s829_s27, 0 }
   0xd   : > { %p1209_p2 = scmp.eq.s32.totalorder %s829_s27, 1  ;;  %p194_p3 = scmp.eq.s32.totalorder %s830_s28, 1 }
   0xe   : > { %p1215_p4 = por %p1205_p1, %p115_p0  ;;  %p831_p5 = scmp.ge.s32.totalorder %s1122_s26, 1 }
   0xf   : > { %p1220_p6 = por %p194_p3, %p115_p0  ;;  %p229_p7 = scmp.lt.s32.totalorder %s1122_s26, 3 }
  0x10   : > { %s1441_s7 = scalar_select %p1215_p4, 1, 0 }
  0x11   : > { %s1442_s8 = scalar_select %p1220_p6, 1, 0 }
  0x12   : > { %s1443_s4 = sld [smem:[#allocation15_spill]]  ;;  %p1228_p8 = pnand %p831_p5, %p229_p7 }
  0x13   : > { %s39_s14 = sadd.s32 1, %s1118_s25  ;;  %s102_s15 = sadd.s32 1, %s1110_s23 }
  0x14   : > { %p870_p10 = pneg %p1228_p8  ;;  %p41_p12 = scmp.ge.s32.totalorder %s39_s14, 2 }
  0x16   : > { %p1237_p11 = pnand %p870_p10, %p1205_p1 }
  0x18   : > { %s242_s11 = sshll.u32 %s1443_s4, 4  ;;  %p967_p0 = pneg %p1237_p11  ;;  %s243_s11 = int_to_ptr.vmem [resolvable:$true] %s242_s11 }
  0x19   : > { %s965_s16 = scalar_lea.vmem %s243_s11, 16  ;;  %p973_p7 = scmp.lt.s32.totalorder %s243_s11, %s243_s11 }
  0x1a   : > { %p966_p13 = scmp.ne.s32.totalorder %s243_s11, %s965_s16  ;;  %p974_p6 = scmp.lt.s32.totalorder %s965_s16, %s965_s16 }
  0x1c   : > { %p968_p3 = pnand %p967_p0, %p966_p13  ;;  %p975_p9 = por %p974_p6, %p973_p7 }
  0x1e   : > { %p969_p5 = pneg %p968_p3 }
  0x20   : > { %p976_p4 = pnand %p975_p9, %p969_p5 }
  0x22   : > { %979 = shalt.err (!%p976_p4)
}
  0x23   : > { %s1124_s17 = smov [#allocation6]   ;;  %s1459_s14 = smov (%p41_p12, %s39_s14), 0 }
  0x24   : > { %873 = dma.vmem_to_smem (!%p1237_p11), %s243_s11, 16, %s1124_s17, [#allocation5]  }
  0x25   : > { %1446 = sst [smem:[#allocation14_spill]] %s1459_s14  ;;  %p109_p10 = scmp.ne.s32.totalorder %s1110_s23, %s1106_s22 }
  0x26   : > { %p110_p6 = scmp.eq.s32.totalorder %s1122_s26, 0  ;;  %s99_s18 = ssub.s32 %s1118_s25, %s1459_s14 }
  0x27   : > { %p886_p4 = scmp.lt.s32.totalorder %s1122_s26, 2  ;;  %p100_p9 = scmp.eq.s32.totalorder %s99_s18, 0 }
  0x28   : > { %p111_p13 = por %p110_p6, %p109_p10  ;;  %p1257_p0 = por %p1209_p2, %p109_p10 }
  0x29   : > { %s273_s20 = sand.u32 1, %s1110_s23   ;;  %s835_s9 = sshll.u32 %s1118_s25, 7 }
  0x2a   : > { %s1263_s27 = scalar_select %p100_p9, %s1110_s23, %s102_s15  }
  0x2b   : > { %s834_s28 = sshll.u32 %s273_s20, 3  ;;  %s282_s13 = scalar_lea.hbm %s1431_s2, %s835_s9 }
  0x2c   : > { %s277_s16 = scalar_lea.vmem [#allocation2], %s834_s28  ;;  %p1269_p11 = pnand %p886_p4, %p111_p13 }
  0x2d   : > { %s284_s17 = sshll.u32 %s277_s16, 4  ;;  %s274_s30 = scalar_lea.sflag [#allocation3], %s273_s20  ;;  %s285_s17 = int_to_ptr.vmem [resolvable:$true] %s284_s17 }
  0x2e   : > { %p982_p2 = pneg %p1269_p11  ;;  %s993_s4 = scalar_lea.vmem %s285_s17, 128 }
  0x2f   : > { %p994_p12 = scmp.ne.s32.totalorder %s285_s17, %s993_s4  ;;  %s1125_s15 = smov [#allocation2]  }
  0x30   : > { %s998_s14 = sshll.u32 %s1125_s15, 4  ;;  %s999_s14 = int_to_ptr.vmem [resolvable:$false] %s998_s14 }
  0x31   : > { %p996_p3 = pnand %p994_p12, %p982_p2  ;;  %s1000_s10 = scalar_lea.vmem %s999_s14, 256 }
  0x32   : > { %p1001_p7 = scmp.lt.s32.totalorder %s285_s17, %s999_s14  ;;  %p1002_p10 = scmp.lt.s32.totalorder %s1000_s10, %s993_s4 }
  0x33   : > { %p997_p5 = pneg %p996_p3 }
  0x34   : > { %p1003_p6 = por %p1002_p10, %p1001_p7 }
  0x36   : > { %p1004_p9 = pnand %p1003_p6, %p997_p5 }
  0x38   : > { %1007 = shalt.err (!%p1004_p9)
}
  0x39   : > { %877 = dma.hbm_to_vmem [thread:$0]  (!%p1269_p11), %s282_s13, 128, %s285_s17, %s274_s30  }
  0x3a   : > { %300 = sbr.rel (%p1228_p8) target bundleno = 601 (0x259), region = 40  ;;  %s1280_s20 = sand.u32 (!%p1228_p8), 1, %s1106_s22  }
  0x3b   : > { %s1283_s28 = sshll.u32 (!%p1228_p8), %s1280_s20, 3  ;;  %s303_s14 = scalar_lea.sflag (!%p1228_p8), [#allocation3], %s1280_s20 }
  0x3c   : > { %s306_s4 = scalar_lea.vmem (!%p1228_p8), [#allocation2], %s1283_s28  ;;  %p1449_p4 = scmp.ne.s32.totalorder (!%p1228_p8), %s1441_s7, 0 }
  0x3f   : > { %1085 = dma.done.wait (%p1449_p4), %s303_s14, 128  }
  0x40   : > { %1087 = vsyncadd (%p1449_p4), %s303_s14, 4294967168 }
  0x41   : > { %1089 = dma.done.wait (%p1205_p1), [#allocation5], 16  }
  0x42   : > { %1091 = vsyncadd (%p1205_p1), [#allocation5], 4294967280 }
  0x43   : > { %315 = sfence }
  0x44   : > { %p363_p8 = scmp.lt.s32.totalorder %s1114_s24, 1  ;;  %v382_v0 = vlaneseq  ;;  %vm386_vm1 = vcmask 64512   ;;  %s1126_s18 = smov 126   ;;  %v1127_v7 = vmov 0   ;;  %v1129_v12 = vmov 1   ;;  %v407_v19 = vld [vmem:[%s306_s4] sm:$0xff] }
  0x45   : > { %947 = vset.pattern.permute.xlu1 %v1127_v7  ;;  %946 = vset.pattern.permute.xlu0 %v1127_v7  ;;  %s1128_s30 = smov 127   ;;  %v1130_v20 = vmov 0.0   ;;  %vm1131_vm2 = vmmov 0   ;;  %v1132_v40 = vmov 2   ;;  %v1133_v48 = vmov 3   ;;  %s362_s4 = scalar_lea.vmem [#allocation8], %s1283_s28 }
  0x46   : > { %s1297_s12 = scalar_select %p363_p8, %s1114_s24, 1  ;;  %v1299_v1 = vand.u32 127, %v382_v0  ;;  %855 = vmatprep.subr.mxu0 %v1130_v20  ;;  %857 = vmatprep.mubr.msk.f32.mxu0 %vm1131_vm2, %v1130_v20  ;;  %v489_v22 = vshrl.u32 %v382_v0, 7 }
  0x47   : > { %856 = vmatpush3.msra.mxu0 %v407_v19  ;;  %s663_s29 = sshll.u32 %s362_s4, 4  ;;  %s635_s16 = scalar_lea.sflag [#allocation9], %s1280_s20  ;;  %s664_s29 = int_to_ptr.vmem [resolvable:$true] %s663_s29 }
  0x48   : > { %s841_s9 = sshll.u32 %s1297_s12, 3  ;;  %vm384_vm0 = vcmp.lt.s32.totalorder %v1299_v1, 7  ;;  %s843_s15 = sshll.u32 %s1297_s12, 2  ;;  %v1336_v24 = vsub.s32 0, %v489_v22  ;;  %v1338_v26 = vsub.s32 1, %v489_v22  ;;  %v511_v44 = vsub.s32 2, %v489_v22 }
  0x49   : > { %s376_s13 = scalar_lea.vmem %s1430_s1, %s841_s9  ;;  %s369_s17 = scalar_lea.vmem %s1429_s0, %s841_s9  ;;  %v522_v45 = vsub.s32 3, %v489_v22 }
  0x4a   : > { %v1306_v2 = vld [vmem:[%s376_s13] sm:$0xff]  ;;  %s380_s9 = scalar_lea.vmem %s1432_s3, %s843_s15  ;;  %s849_s12 = sshll.u32 %s1114_s24, 7 }
  0x4b   : > { %v527_v3 = vmul.f32 0.5, %v1306_v2  ;;  %v1312_v4 = vld [vmem:[%s369_s17] sm:$0xff]  ;;  %s661_s13 = scalar_lea.hbm %s1435_s6, %s849_s12  ;;  %s1008_s17 = scalar_lea.vmem %s664_s29, 128 }
  0x4c   : > { %v385_v5 = vsel %vm384_vm0, %v1312_v4, -1e+30  ;;  %v1333_v21 = vld [vmem:[%s380_s9] sm:$0xf]  ;;  %v844_v56 = vmul.f32 -1.442695, %v1312_v4  ;;  %p1009_p1 = scmp.ne.s32.totalorder %s664_s29, %s1008_s17 }
  0x4d   : > { %529 = vrot.lane.b32.xlu1 %v527_v3, %s1126_s18  ;;  %v387_v6 = vsel %vm386_vm1, %v385_v5, -inf  ;;  %v534_v23 = vmul.f32 0.5, %v1333_v21  ;;  %v491_v42 = vrot.slane %v1333_v21, %v1336_v24  ;;  %v501_v43 = vrot.slane %v1333_v21, %v1338_v26  ;;  %s1134_s18 = smov [#allocation8]  }
  0x4e   : > { %388 = vmax.xlane.f32.xlu0 %v387_v6  ;;  %v512_v50 = vrot.slane %v1333_v21, %v511_v44  ;;  %v523_v51 = vrot.slane %v1333_v21, %v522_v45  ;;  %p1010_p13 = pnand %p1009_p1, %p1257_p0 }
  0x4f   : > { %v536_v25 = vrot.slane %v534_v23, 2 }
  0x50   : > { %p1011_p11 = pneg %p1010_p13 }
  0x51   : > { %v538_v27 = vsub.f32 %v1333_v21, %v536_v25  ;;  %v539_v28 = vadd.f32 %v536_v25, %v1333_v21 }
  0x53   : > { %v569_v29 = vrot.slane %v538_v27, %v1336_v24  ;;  %v580_v30 = vrot.slane %v539_v28, %v1338_v26  ;;  %v589_v31 = vrot.slane %v538_v27, %v1338_v26  ;;  %v559_v32 = vrot.slane %v539_v28, %v1336_v24 }
  0x54   : > { %v546_v33 = vsub.f32 %v539_v28, %v538_v27 }
  0x56   : > { %v548_v34 = vrot.slane %v546_v33, 1 }
  0x58   : > { %v550_v35 = vmul.f32 %v548_v34, %v546_v33 }
  0x5a   : > { %v602_v36 = vrot.slane %v550_v35, %v1336_v24 }
  0xbf   : > { %v530_v8 = vpop.permute.xlu1 %529 }
  0xc0   : > { %v532_v9 = vsub.f32 %v1306_v2, %v530_v8  ;;  %v533_v10 = vadd.f32 %v530_v8, %v1306_v2 }
  0xc2   : > { %v540_v11 = vsub.f32 %v533_v10, %v532_v9 }
  0xc4   : > { %542 = vrot.lane.b32.xlu1 %v540_v11, %s1128_s30  ;;  %s1012_s30 = sshll.u32 %s1134_s18, 4  ;;  %s1013_s30 = int_to_ptr.vmem [resolvable:$false] %s1012_s30 }
  0xc5   : > { %s1014_s15 = scalar_lea.vmem %s1013_s30, 256  ;;  %p1015_p2 = scmp.lt.s32.totalorder %s664_s29, %s1013_s30 }
  0xc6   : > { %p1016_p12 = scmp.lt.s32.totalorder %s1014_s15, %s1008_s17 }
  0xc8   : > { %563 = vperm.xlu1 %947, %v532_v9   ;;  %p1017_p3 = por %p1016_p12, %p1015_p2 }
  0xca   : > { %p1018_p5 = pnand %p1017_p3, %p1011_p11 }
  0xcc   : > { %948 = vset.pattern.permute.xlu1 %v1129_v12 }
  0xcd   : > { %574 = vperm.xlu1 %948, %v533_v10  }
  0xd1   : > { %583 = vperm.xlu1 %948, %v532_v9  }
  0xd5   : > { %949 = vset.pattern.permute.xlu1 %v1127_v7 }
  0xd7   : > { %v389_v13 = vpop.xlane.xlu0 %388 }
  0xd8   : > { %v390_v14 = vsub.f32 %v1312_v4, %v389_v13 }
  0xda   : > { %v391_v15 = vmul.f32 1.442695, %v390_v14 }
  0xdc   : > { %953 = vpow2.f32 %v391_v15 }
  0xdd   : > { %955 = vpow2.f32 %v844_v56 }
  0xe9   : > { %v954_v16 = vpop.eup %953 }
  0xea   : > { %v1323_v17 = vsel %vm384_vm0, %v954_v16, 0.0  ;;  %v956_v57 = vpop.eup %955 }
  0xeb   : > { %v394_v18 = vsel %vm386_vm1, %v1323_v17, 0.0  ;;  %v402_v58 = vadd.f32 1.0, %v956_v57 }
  0xec   : > { %395 = vadd.xlane.f32.xlu0 %v394_v18 }
  0xed   : > { %957 = vrcp.f32 %v402_v58 }
  0xfa   : > { %v958_v6 = vpop.eup %957 }
 0x102   : > { %553 = vperm.xlu0 %946, %v533_v10  }
 0x136   : > { %v543_v37 = vpop.permute.xlu1 %542 }
 0x137   : > { %v545_v38 = vmul.f32 %v543_v37, %v540_v11 }
 0x139   : > { %596 = vperm.xlu1 %949, %v545_v38  }
 0x13d   : > { %485 = vperm.xlu1 %949, %v1306_v2  }
 0x141   : > { %950 = vset.pattern.permute.xlu1 %v1129_v12 }
 0x142   : > { %495 = vperm.xlu1 %950, %v1306_v2  }
 0x143   : > { %v564_v39 = vpop.permute.xlu1 %563 }
 0x144   : > { %v570_v60 = vmax.f32 %v564_v39, %v569_v29  ;;  %v606_v61 = vmin.f32 %v564_v39, %v569_v29 }
 0x146   : > { %951 = vset.pattern.permute.xlu1 %v1132_v40 }
 0x147   : > { %506 = vperm.xlu1 %951, %v1306_v2  }
 0x148   : > { %v575_v41 = vpop.permute.xlu1 %574 }
 0x149   : > { %v581_v46 = vmin.f32 %v575_v41, %v580_v30  ;;  %v608_v47 = vmax.f32 %v575_v41, %v580_v30 }
 0x14b   : > { %952 = vset.pattern.permute.xlu1 %v1133_v48 }
 0x14c   : > { %v584_v49 = vpop.permute.xlu1 %583  ;;  %517 = vperm.xlu1 %952, %v1306_v2  }
 0x14d   : > { %v590_v52 = vmax.f32 %v584_v49, %v589_v31  ;;  %v609_v53 = vmin.f32 %v584_v49, %v589_v31 }
 0x14f   : > { %v591_v54 = vsub.f32 %v581_v46, %v590_v52  ;;  %v610_v55 = vsub.f32 %v608_v47, %v609_v53 }
 0x151   : > { %v592_v2 = vmax.f32 %v591_v54, 0.0 }
 0x175   : > { %v396_v59 = vpop.xlane.xlu0 %395 }
 0x176   : > { %959 = vrcp.f32 %v396_v59 }
 0x17d   : > { %v554_v62 = vpop.permute.xlu0 %553 }
 0x17e   : > { %v560_v63 = vmin.f32 %v554_v62, %v559_v32  ;;  %v605_v0 = vmax.f32 %v554_v62, %v559_v32 }
 0x180   : > { %v571_v3 = vsub.f32 %v560_v63, %v570_v60  ;;  %v607_v5 = vsub.f32 %v605_v0, %v606_v61 }
 0x182   : > { %v572_v7 = vmax.f32 %v571_v3, 0.0  ;;  %v611_v8 = vmul.f32 %v610_v55, %v607_v5 }
 0x183   : > { %v960_v4 = vpop.eup %959 }
 0x184   : > { %v398_v9 = vmul.f32 %v960_v4, %v1323_v17  ;;  %v593_v10 = vmul.f32 %v592_v2, %v572_v7  ;;  %v616_v12 = vmax.f32 %v611_v8, 1e-12 }
 0x186   : > { %v405_v11 = vsel %vm384_vm0, %v398_v9, %v958_v6  ;;  %961 = vrcp.f32 %v616_v12 }
 0x187   : > { %858 = vmatmul.mubr.msk.f32.vlgmr.msra.gmra.mxu0 %vm386_vm1, %v405_v11  ;;  %406 = vst.msk [vmem:[%s362_s4] sm:$0xff] %vm386_vm1, %v405_v11 }
 0x193   : > { %v962_v16 = vpop.eup %961 }
 0x1b4   : > { %v597_v13 = vpop.permute.xlu1 %596 }
 0x1b5   : > { %v603_v14 = vadd.f32 %v602_v36, %v597_v13 }
 0x1b7   : > { %v604_v15 = vsub.f32 %v603_v14, %v593_v10 }
 0x1b8   : > { %v486_v18 = vpop.permute.xlu1 %485 }
 0x1b9   : > { %v612_v19 = vmax.f32 %v604_v15, 1e-12  ;;  %v615_v20 = vsub.f32 %v611_v8, %v604_v15  ;;  %v492_v17 = vsub.f32 %v486_v18, %v491_v42 }
 0x1bb   : > { %963 = vrcp.f32 %v612_v19  ;;  %v618_v21 = vmul.f32 %v962_v16, %v615_v20  ;;  %v493_v22 = vand.u32 2147483647, %v492_v17 }
 0x1bd   : > { %v496_v1 = vpop.permute.xlu1 %495 }
 0x1be   : > { %v502_v23 = vsub.f32 %v496_v1, %v501_v43 }
 0x1c0   : > { %v503_v24 = vand.u32 2147483647, %v502_v23 }
 0x1c2   : > { %v504_v25 = vadd.f32 %v503_v24, %v493_v22  ;;  %v507_v26 = vpop.permute.xlu1 %506 }
 0x1c3   : > { %v513_v27 = vsub.f32 %v507_v26, %v512_v50 }
 0x1c5   : > { %v514_v28 = vand.u32 2147483647, %v513_v27 }
 0x1c7   : > { %v515_v29 = vadd.f32 %v514_v28, %v504_v25  ;;  %v518_v30 = vpop.permute.xlu1 %517 }
 0x1c8   : > { %v964_v31 = vpop.eup %963  ;;  %v524_v32 = vsub.f32 %v518_v30, %v523_v51 }
 0x1c9   : > { %v614_v33 = vmul.f32 %v964_v31, %v593_v10 }
 0x1ca   : > { %v525_v34 = vand.u32 2147483647, %v524_v32 }
 0x1cb   : > { %v619_v35 = vsub.f32 %v614_v33, %v618_v21 }
 0x1cc   : > { %v526_v36 = vadd.f32 %v525_v34, %v515_v29 }
 0x1cd   : > { %1021 = shalt.err (!%p1018_p5)
}
 0x1ce   : > { %s1022_s10 = scalar_lea.hbm %s661_s13, 128  ;;  %s1026_s4 = scalar_lea.hbm %s1435_s6, 256 }
 0x1cf   : > { %p1023_p7 = scmp.ne.s32.totalorder %s661_s13, %s1022_s10  ;;  %p1027_p9 = scmp.lt.s32.totalorder %s661_s13, %s1435_s6 }
 0x1d0   : > { %p1028_p4 = scmp.lt.s32.totalorder %s1026_s4, %s1022_s10 }
 0x1d1   : > { %p1024_p10 = pnand %p1023_p7, %p1257_p0 }
 0x1d2   : > { %p1029_p8 = por %p1028_p4, %p1027_p9 }
 0x1d3   : > { %p1025_p6 = pneg %p1024_p10 }
 0x1d5   : > { %p1030_p1 = pnand %p1029_p8, %p1025_p6 }
 0x1d7   : > { %1033 = shalt.err (!%p1030_p1)
}
 0x1d8   : > { %867 = dma.vmem_to_hbm [thread:$0]  (%p1257_p0), %s664_s29, 128, %s661_s13, %s635_s16  }
 0x1d9   : > { %s846_s17 = sld [smem:[#allocation6 + $0x1]]  ;;  %s355_s30 = scalar_lea.vmem [#allocation7], %s1283_s28 }
 0x1da   : > { %s620_s18 = sld [smem:[#allocation6]]  ;;  %s649_s15 = sshll.u32 %s355_s30, 4  ;;  %s650_s15 = int_to_ptr.vmem [resolvable:$true] %s649_s15 }
 0x1db   : > { %s647_s9 = scalar_lea.hbm %s1434_s5, %s849_s12  ;;  %s630_s13 = scalar_lea.sflag [#allocation4], %s1280_s20 }
 0x1dc   : > { %s1034_s29 = scalar_lea.vmem %s650_s15, 128  ;;  %s1135_s16 = smov [#allocation7]  }
 0x1dd   : > { %p1035_p13 = scmp.ne.s32.totalorder %s650_s15, %s1034_s29  ;;  %s1038_s28 = sshll.u32 %s1135_s16, 4  ;;  %s1039_s28 = int_to_ptr.vmem [resolvable:$false] %s1038_s28 }
 0x1de   : > { %s1040_s4 = scalar_lea.vmem %s1039_s28, 256  ;;  %p1041_p12 = scmp.lt.s32.totalorder %s650_s15, %s1039_s28 }
 0x1df   : > { %v622_v37 = vstv %s846_s17  ;;  %p1036_p11 = pnand %p1035_p13, %p1257_p0  ;;  %p1042_p3 = scmp.lt.s32.totalorder %s1040_s4, %s1034_s29 }
 0x1e0   : > { %v625_v38 = vstv %s620_s18  ;;  %v623_v39 = vmul.f32 %v622_v37, %v526_v36 }
 0x1e1   : > { %v626_v42 = vmul.f32 %v625_v38, %v619_v35  ;;  %p1037_p2 = pneg %p1036_p11  ;;  %p1043_p5 = por %p1042_p3, %p1041_p12 }
 0x1e3   : > { %p1044_p7 = pnand %p1043_p5, %p1037_p2 }
 0x247   : > { %v477_v40 = vpop.f32.mrf.mxu0 }
 0x248   : > { %v624_v41 = vadd.f32 %v623_v39, %v477_v40 }
 0x249   : > { %v859_v43 = vpop.f32.mrf.mxu0 }
 0x24a   : > { %v627_v44 = vsub.f32 %v624_v41, %v626_v42 }
 0x24c   : > { %628 = vst [vmem:[%s355_s30] sm:$0xff] %v627_v44 }
 0x24d   : > { %1047 = shalt.err (!%p1044_p7)
}
 0x24e   : > { %s1048_s24 = scalar_lea.hbm %s647_s9, 128  ;;  %s1052_s11 = scalar_lea.hbm %s1434_s5, 256 }
 0x24f   : > { %p1049_p10 = scmp.ne.s32.totalorder %s647_s9, %s1048_s24  ;;  %p1053_p4 = scmp.lt.s32.totalorder %s647_s9, %s1434_s5 }
 0x250   : > { %p1054_p8 = scmp.lt.s32.totalorder %s1052_s11, %s1048_s24 }
 0x251   : > { %p1050_p6 = pnand %p1049_p10, %p1257_p0 }
 0x252   : > { %p1055_p1 = por %p1054_p8, %p1053_p4 }
 0x253   : > { %p1051_p9 = pneg %p1050_p6 }
 0x255   : > { %p1056_p13 = pnand %p1055_p1, %p1051_p9 }
 0x257   : > { %1059 = shalt.err (!%p1056_p13)
}
 0x258   : > { %866 = dma.vmem_to_hbm [thread:$0]  (%p1257_p0), %s650_s15, 128, %s647_s9, %s630_s13  }
 0x259 PF: > { %s675_s18 = sand.u32 1, %s1102_s21   ;;  %p1450_p11 = scmp.ne.s32.totalorder %s1442_s8, 0 }
 0x25a   : > { %p1451_p2 = scmp.ge.s32.totalorder %s1122_s26, 2  ;;  %s676_s30 = scalar_lea.sflag [#allocation4], %s675_s18 }
 0x25c   : > { %p879_p12 = pnand %p1451_p2, %p1450_p11 }
 0x25e   : > { %p880_p3 = pneg %p879_p12 }
 0x260   : > { %1093 = dma.done.wait (%p880_p3), %s676_s30, 128  }
 0x261   : > { %1095 = vsyncadd (%p880_p3), %s676_s30, 4294967168  ;;  %s685_s10 = scalar_lea.sflag [#allocation9], %s675_s18 }
 0x262   : > { %1097 = dma.done.wait (%p880_p3), %s685_s10, 128  }
 0x263   : > { %1099 = vsyncadd (%p880_p3), %s685_s10, 4294967168  ;;  %s27_s26 = sadd.s32 1, %s1122_s26   ;;  %s1452_s19 = sld [smem:[#allocation14_spill]] }
 0x264   : > { %p24_p5 = scmp.ge.s32.totalorder %s27_s26, 4   ;;  %s1453_s21 = smov %s1106_s22 }
 0x265   : > { %s1454_s22 = smov %s1110_s23  ;;  %s1455_s23 = smov %s1263_s27 }
 0x266   : > { %s1456_s24 = smov %s1118_s25  ;;  %26 = sbr.rel (!%p24_p5) target bundleno = 11 (0xb), region = 116 }
 0x269   : > { %s1457_s25 = smov %s1452_s19 }
 0x26b   :  { %690 = vsyncpa [#allocation3], 1 }
 0x26c   :  { %692 = vsyncpa [#allocation3 + $0x1], 1 }
 0x26d   :  { %693 = vsyncpa [#allocation4], 1 }
 0x26e   :  { %695 = vsyncpa [#allocation4 + $0x1], 1 }
 0x26f   :  { %696 = vsyncpa [#allocation9], 1 }
 0x270   :  { %698 = vsyncpa [#allocation9 + $0x1], 1 }
 0x271   :  { %699 = vsyncpa [#allocation5], 1 }
 0x272   :  { %701 = vsyncpa [#allocation5 + $0x1], 1 }

</bundles_post_ra>
